<compile_context>
chip_gen: v7x
topology: tpu7x:2x2x1
jax: 0.10.0
libtpu: 0.0.40
codegen_flags: <defaults>
</compile_context>

<pallas_src>
import functools

import numpy as np
import jax
import jax.numpy as jnp
from jax import lax
from jax.experimental import pallas as pl
from jax.experimental.pallas import tpu as pltpu


def _round_up(a, m):
    return (a + m - 1) // m * m


def _cdiv(a, b):
    return (a + b - 1) // b


def _choose_batch_tiles(batch, max_block, lane=128):
    """Pick a lane tile (multiple of 128) and padded batch size.

    Rules: tiles as large as `max_block` allows (HBM-roofline efficiency), but
    at least 2 grid steps whenever the batch spans more than one lane tile so
    the "parallel" grid axis can feed both v7x TensorCores.
    """
    max_block = _round_up(max(int(max_block), lane), lane)
    bp = _round_up(batch, lane)
    if bp <= lane:
        return lane, lane                       # tiny batch: one 128-lane tile
    bb = min(max_block, _round_up(_cdiv(bp, 2), lane))
    bp = _round_up(bp, bb)
    return bb, bp


# --------------------------------------------------------------------------
# Kernels (feature-major: arrays are (features, batch), batch on lanes)
# --------------------------------------------------------------------------

def _gru_ode_cell_fm_kernel(x_ref, h_ref, wxz_ref, wxn_ref, bxz_ref, bxn_ref,
                            whz_ref, whn_ref, dh_ref, *, mm_dtype):
    """One GRU-ODE cell evaluation on a (features, batch_tile) block."""
    x = x_ref[...].astype(mm_dtype)           # (Din, bb)
    h = h_ref[...]                             # (H,   bb)  f32

    xz = jnp.dot(wxz_ref[...].astype(mm_dtype), x,
                 preferred_element_type=jnp.float32) + bxz_ref[...]
    xn = jnp.dot(wxn_ref[...].astype(mm_dtype), x,
                 preferred_element_type=jnp.float32) + bxn_ref[...]

    z = jax.nn.sigmoid(
        xz + jnp.dot(whz_ref[...].astype(mm_dtype), h.astype(mm_dtype),
                     preferred_element_type=jnp.float32))
    n = jnp.tanh(
        xn + jnp.dot(whn_ref[...].astype(mm_dtype), (z * h).astype(mm_dtype),
                     preferred_element_type=jnp.float32))

    dh_ref[...] = ((1.0 - z) * (n - h)).astype(dh_ref.dtype)


def _gru_ode_euler_fm_kernel(x_ref, h0_ref, wxz_ref, wxn_ref, bxz_ref, bxn_ref,
                             whz_ref, whn_ref, h_out_ref, *, n_steps, delta_t,
                             unroll, mm_dtype):
    """Explicit-Euler integration h <- h + dt * cell(x, h), n_steps times.

    x is constant across steps so its projection is hoisted; weights and the
    h carry stay in VMEM/vregs for the whole integration of this batch tile.
    """
    x = x_ref[...].astype(mm_dtype)
    xz = jnp.dot(wxz_ref[...].astype(mm_dtype), x,
                 preferred_element_type=jnp.float32) + bxz_ref[...]
    xn = jnp.dot(wxn_ref[...].astype(mm_dtype), x,
                 preferred_element_type=jnp.float32) + bxn_ref[...]
    whz = whz_ref[...].astype(mm_dtype)
    whn = whn_ref[...].astype(mm_dtype)

    def body(_, h):
        z = jax.nn.sigmoid(
            xz + jnp.dot(whz, h.astype(mm_dtype),
                         preferred_element_type=jnp.float32))
        n = jnp.tanh(
            xn + jnp.dot(whn, (z * h).astype(mm_dtype),
                         preferred_element_type=jnp.float32))
        return h + delta_t * (1.0 - z) * (n - h)

    h_out_ref[...] = lax.fori_loop(
        0, n_steps, body, h0_ref[...], unroll=unroll).astype(h_out_ref.dtype)


# --------------------------------------------------------------------------
# Feature-major wrappers (no transposes; for callers that keep state as
# (features, batch)).  Batch is padded to a lane multiple and tiled on a
# "parallel" grid axis.
# --------------------------------------------------------------------------

def _weight_specs(H, Din):
    const = lambda i: (0, 0)
    return [
        pl.BlockSpec((H, Din), const),   # wxz
        pl.BlockSpec((H, Din), const),   # wxn
        pl.BlockSpec((H, 1), const),     # bxz
        pl.BlockSpec((H, 1), const),     # bxn
        pl.BlockSpec((H, H), const),     # whz
        pl.BlockSpec((H, H), const),     # whn
    ]


def gru_ode_cell_fm(x_fm, h_fm, params, *, block_b=2048,
                    matmul_dtype=jnp.bfloat16):
    """dh (feature-major).  x_fm: (Din, B), h_fm: (H, B) -> (H, B)."""
    Din, B = x_fm.shape
    H = h_fm.shape[0]
    bb, Bp = _choose_batch_tiles(B, block_b)
    if Bp != B:
        x_fm = jnp.pad(x_fm, ((0, 0), (0, Bp - B)))
        h_fm = jnp.pad(h_fm, ((0, 0), (0, Bp - B)))

    batched = lambda f: pl.BlockSpec((f, bb), lambda i: (0, i))
    out = pl.pallas_call(
        functools.partial(_gru_ode_cell_fm_kernel, mm_dtype=matmul_dtype),
        out_shape=jax.ShapeDtypeStruct((H, Bp), jnp.float32),
        grid=(Bp // bb,),
        in_specs=[batched(Din), batched(H)] + _weight_specs(H, Din),
        out_specs=batched(H),
        compiler_params=pltpu.CompilerParams(
            dimension_semantics=("parallel",)),
    )(x_fm, h_fm, params["wxz"], params["wxn"], params["bxz"], params["bxn"],
      params["whz"], params["whn"])
    return out[:, :B]


def gru_ode_euler_fm(x_fm, h0_fm, params, *, n_steps, delta_t, block_b=256,
                     unroll=4, matmul_dtype=jnp.bfloat16):
    """Fused multi-step Euler integration, feature-major, tiled over batch."""
    Din, B = x_fm.shape
    H = h0_fm.shape[0]
    bb, Bp = _choose_batch_tiles(B, block_b)
    if Bp != B:
        x_fm = jnp.pad(x_fm, ((0, 0), (0, Bp - B)))
        h0_fm = jnp.pad(h0_fm, ((0, 0), (0, Bp - B)))

    batched = lambda f: pl.BlockSpec((f, bb), lambda i: (0, i))
    out = pl.pallas_call(
        functools.partial(_gru_ode_euler_fm_kernel, n_steps=int(n_steps),
                          delta_t=float(delta_t), unroll=int(unroll),
                          mm_dtype=matmul_dtype),
        out_shape=jax.ShapeDtypeStruct((H, Bp), jnp.float32),
        grid=(Bp // bb,),
        in_specs=[batched(Din), batched(H)] + _weight_specs(H, Din),
        out_specs=batched(H),
        compiler_params=pltpu.CompilerParams(
            dimension_semantics=("parallel",)),
    )(x_fm, h0_fm, params["wxz"], params["wxn"], params["bxz"], params["bxn"],
      params["whz"], params["whn"])
    return out[:, :B]


# --------------------------------------------------------------------------
# Batch-major convenience wrappers (PyTorch-style (B, features) tensors).
# The transposes are pure layout plumbing; callers that can keep their state
# feature-major should use the *_fm entry points directly.
# --------------------------------------------------------------------------

def gru_ode_cell(x, h, params, *, block_b=2048, matmul_dtype=jnp.bfloat16):
    """dh = GRUODECell.forward(x, h).  x: (B, Din), h: (B, H) -> (B, H)."""
    dh_fm = gru_ode_cell_fm(x.T, h.T, params, block_b=block_b,
                            matmul_dtype=matmul_dtype)
    return dh_fm.T


def gru_ode_euler(x, h0, params, *, n_steps, delta_t, block_b=256, unroll=4,
                  matmul_dtype=jnp.bfloat16):
    """h_T after n_steps of h <- h + delta_t * GRUODECell(x, h)."""
    h_fm = gru_ode_euler_fm(x.T, h0.T, params, n_steps=n_steps,
                            delta_t=delta_t, block_b=block_b, unroll=unroll,
                            matmul_dtype=matmul_dtype)
    return h_fm.T


# --------------------------------------------------------------------------
# Parameters (PyTorch nn.Linear default init, PyTorch-native (out, in) layout)
# --------------------------------------------------------------------------

def init_gru_ode_cell_params(key, input_size, hidden_size):
    ks = jax.random.split(key, 6)
    lx = 1.0 / float(np.sqrt(input_size))
    lh = 1.0 / float(np.sqrt(hidden_size))
    u = lambda k, shape, lim: jax.random.uniform(k, shape, jnp.float32, -lim, lim)
    return {
        "wxz": u(ks[0], (hidden_size, input_size), lx),   # lin_xz.weight (out, in)
        "wxn": u(ks[1], (hidden_size, input_size), lx),   # lin_xn.weight
        "bxz": u(ks[2], (hidden_size, 1), lx),            # lin_xz.bias
        "bxn": u(ks[3], (hidden_size, 1), lx),            # lin_xn.bias
        "whz": u(ks[4], (hidden_size, hidden_size), lh),  # lin_hz.weight (bias=False)
        "whn": u(ks[5], (hidden_size, hidden_size), lh),  # lin_hn.weight (bias=False)
    }


# Pure-JAX reference (mirrors the PyTorch forward exactly, f32 throughout).
def gru_ode_cell_ref(x, h, params):
    z = jax.nn.sigmoid(x @ params["wxz"].T + params["bxz"][:, 0]
                       + h @ params["whz"].T)
    n = jnp.tanh(x @ params["wxn"].T + params["bxn"][:, 0]
                 + (z * h) @ params["whn"].T)
    return (1.0 - z) * (n - h)


# --------------------------------------------------------------------------
# Demo
# --------------------------------------------------------------------------

if __name__ == "__main__":
    D = 4
    input_size = 2 * D        # "for p(t) modelling input_size should be 2x the x size"
    hidden_size = 32
    batch = 8

    root = jax.random.PRNGKey(0)
    k_param, k_x, k_h = jax.random.split(root, 3)

    params = init_gru_ode_cell_params(k_param, input_size, hidden_size)
    x = jax.random.normal(k_x, (batch, input_size), jnp.float32)
    h = jax.random.normal(k_h, (batch, hidden_size), jnp.float32)

    # --- Single-step forward (the module's forward pass) ------------------
    dh_ref = gru_ode_cell_ref(x, h, params)

    # Exact-precision path (f32 MXU operands).
    dh_f32 = gru_ode_cell(x, h, params, matmul_dtype=jnp.float32)
    jax.block_until_ready(dh_f32)
    np.testing.assert_allclose(np.asarray(dh_f32), np.asarray(dh_ref),
                               rtol=1e-4, atol=1e-4)

    # Optimized path (bf16 MXU operands, f32 accumulation / elementwise).
    dh = gru_ode_cell(x, h, params)
    jax.block_until_ready(dh)
    np.testing.assert_allclose(np.asarray(dh), np.asarray(dh_ref),
                               rtol=5e-2, atol=1e-2)

    # --- Fused Euler integration (how GRU-ODE consumes this cell) ---------
    n_steps, delta_t = 10, 0.1
    h_ref = h
    for _ in range(n_steps):
        h_ref = h_ref + delta_t * gru_ode_cell_ref(x, h_ref, params)

    h_T_f32 = gru_ode_euler(x, h, params, n_steps=n_steps, delta_t=delta_t,
                            matmul_dtype=jnp.float32)
    jax.block_until_ready(h_T_f32)
    np.testing.assert_allclose(np.asarray(h_T_f32), np.asarray(h_ref),
                               rtol=1e-3, atol=1e-4)

    h_T = gru_ode_euler(x, h, params, n_steps=n_steps, delta_t=delta_t)
    jax.block_until_ready(h_T)
    np.testing.assert_allclose(np.asarray(h_T), np.asarray(h_ref),
                               rtol=5e-2, atol=2e-2)

    print("KERNEL_OK")
</pallas_src>

<mosaic_0001>
module attributes {stable_mosaic.version = 11 : i64} {
  func.func @_gru_ode_cell_fm_kernel(%arg0: i32, %arg1: memref<8x128xf32, #tpu.memory_space<vmem>>, %arg2: memref<32x128xf32, #tpu.memory_space<vmem>>, %arg3: memref<32x8xf32, #tpu.memory_space<vmem>>, %arg4: memref<32x8xf32, #tpu.memory_space<vmem>>, %arg5: memref<32x1xf32, #tpu.memory_space<vmem>>, %arg6: memref<32x1xf32, #tpu.memory_space<vmem>>, %arg7: memref<32x32xf32, #tpu.memory_space<vmem>>, %arg8: memref<32x32xf32, #tpu.memory_space<vmem>>, %arg9: memref<32x128xf32, #tpu.memory_space<vmem>>) attributes {dimension_semantics = [#tpu.dimension_semantics<parallel>], iteration_bounds = array<i64: 1>, scalar_prefetch = 0 : i64, scratch_operands = 0 : i64, tpu.core_type = #tpu.core_type<tc>, window_params = [{transform_indices = @transform_0, window_bounds = array<i64: 8, 128>}, {transform_indices = @transform_1, window_bounds = array<i64: 32, 128>}, {pipeline_mode = #tpu.pipeline_mode<synchronous>, transform_indices = @transform_2, window_bounds = array<i64: 32, 8>}, {pipeline_mode = #tpu.pipeline_mode<synchronous>, transform_indices = @transform_3, window_bounds = array<i64: 32, 8>}, {pipeline_mode = #tpu.pipeline_mode<synchronous>, transform_indices = @transform_4, window_bounds = array<i64: 32, 1>}, {pipeline_mode = #tpu.pipeline_mode<synchronous>, transform_indices = @transform_5, window_bounds = array<i64: 32, 1>}, {pipeline_mode = #tpu.pipeline_mode<synchronous>, transform_indices = @transform_6, window_bounds = array<i64: 32, 32>}, {pipeline_mode = #tpu.pipeline_mode<synchronous>, transform_indices = @transform_7, window_bounds = array<i64: 32, 32>}, {transform_indices = @transform_8, window_bounds = array<i64: 32, 128>}]} {
    %c0 = arith.constant 0 : index
    %c0_0 = arith.constant 0 : index
    %0 = vector.load %arg1[%c0, %c0_0] : memref<8x128xf32, #tpu.memory_space<vmem>>, vector<8x128xf32>
    %c0_1 = arith.constant 0 : index
    %c0_2 = arith.constant 0 : index
    %1 = vector.load %arg2[%c0_1, %c0_2] : memref<32x128xf32, #tpu.memory_space<vmem>>, vector<32x128xf32>
    %c0_3 = arith.constant 0 : index
    %c0_4 = arith.constant 0 : index
    %2 = vector.load %arg3[%c0_3, %c0_4] : memref<32x8xf32, #tpu.memory_space<vmem>>, vector<32x8xf32>
    %cst = arith.constant dense<0.000000e+00> : vector<32x128xf32>
    %3 = tpu.matmul %2, %0, %cst {dimension_numbers = #tpu.dot_dimension_numbers<[1], [0], [0], [1], [0, 0, 1, 1], [], []>} : vector<32x8xf32>, vector<8x128xf32>, vector<32x128xf32> -> vector<32x128xf32>
    %c0_5 = arith.constant 0 : index
    %c0_6 = arith.constant 0 : index
    %4 = vector.load %arg5[%c0_5, %c0_6] : memref<32x1xf32, #tpu.memory_space<vmem>>, vector<32x1xf32>
    %5 = vector.broadcast %4 : vector<32x1xf32> to vector<32x128xf32>
    %6 = arith.addf %3, %5 : vector<32x128xf32>
    %c0_7 = arith.constant 0 : index
    %c0_8 = arith.constant 0 : index
    %7 = vector.load %arg4[%c0_7, %c0_8] : memref<32x8xf32, #tpu.memory_space<vmem>>, vector<32x8xf32>
    %cst_9 = arith.constant dense<0.000000e+00> : vector<32x128xf32>
    %8 = tpu.matmul %7, %0, %cst_9 {dimension_numbers = #tpu.dot_dimension_numbers<[1], [0], [0], [1], [0, 0, 1, 1], [], []>} : vector<32x8xf32>, vector<8x128xf32>, vector<32x128xf32> -> vector<32x128xf32>
    %c0_10 = arith.constant 0 : index
    %c0_11 = arith.constant 0 : index
    %9 = vector.load %arg6[%c0_10, %c0_11] : memref<32x1xf32, #tpu.memory_space<vmem>>, vector<32x1xf32>
    %10 = vector.broadcast %9 : vector<32x1xf32> to vector<32x128xf32>
    %11 = arith.addf %8, %10 : vector<32x128xf32>
    %c0_12 = arith.constant 0 : index
    %c0_13 = arith.constant 0 : index
    %12 = vector.load %arg7[%c0_12, %c0_13] : memref<32x32xf32, #tpu.memory_space<vmem>>, vector<32x32xf32>
    %cst_14 = arith.constant dense<0.000000e+00> : vector<32x128xf32>
    %13 = tpu.matmul %12, %1, %cst_14 {dimension_numbers = #tpu.dot_dimension_numbers<[1], [0], [0], [1], [0, 0, 1, 1], [], []>} : vector<32x32xf32>, vector<32x128xf32>, vector<32x128xf32> -> vector<32x128xf32>
    %14 = arith.addf %6, %13 : vector<32x128xf32>
    %15 = arith.negf %14 : vector<32x128xf32>
    %16 = math.exp %15 : vector<32x128xf32>
    %cst_15 = arith.constant 1.000000e+00 : f32
    %17 = vector.broadcast %cst_15 : f32 to vector<32x128xf32>
    %18 = arith.addf %17, %16 : vector<32x128xf32>
    %19 = arith.divf %17, %18 : vector<32x128xf32>
    %c0_16 = arith.constant 0 : index
    %c0_17 = arith.constant 0 : index
    %20 = vector.load %arg8[%c0_16, %c0_17] : memref<32x32xf32, #tpu.memory_space<vmem>>, vector<32x32xf32>
    %21 = arith.mulf %19, %1 : vector<32x128xf32>
    %cst_18 = arith.constant dense<0.000000e+00> : vector<32x128xf32>
    %22 = tpu.matmul %20, %21, %cst_18 {dimension_numbers = #tpu.dot_dimension_numbers<[1], [0], [0], [1], [0, 0, 1, 1], [], []>} : vector<32x32xf32>, vector<32x128xf32>, vector<32x128xf32> -> vector<32x128xf32>
    %23 = arith.addf %11, %22 : vector<32x128xf32>
    %24 = math.tanh %23 : vector<32x128xf32>
    %cst_19 = arith.constant 1.000000e+00 : f32
    %25 = vector.broadcast %cst_19 : f32 to vector<32x128xf32>
    %26 = arith.subf %25, %19 : vector<32x128xf32>
    %27 = arith.subf %24, %1 : vector<32x128xf32>
    %28 = arith.mulf %26, %27 : vector<32x128xf32>
    %c0_20 = arith.constant 0 : index
    %c0_21 = arith.constant 0 : index
    %29 = vector.load %arg9[%c0_20, %c0_21] : memref<32x128xf32, #tpu.memory_space<vmem>>, vector<32x128xf32>
    tpu.vector_store %arg9[%c0_20, %c0_21], %28 {strides = array<i32>} : memref<32x128xf32, #tpu.memory_space<vmem>>, vector<32x128xf32>,
    return
  }
  func.func @transform_0(%arg0: i32) -> (i32, i32) {
    %c0_i32 = arith.constant 0 : i32
    %c0_i32_0 = arith.constant 0 : i32
    return %c0_i32, %arg0 : i32, i32
  }
  func.func @transform_1(%arg0: i32) -> (i32, i32) {
    %c0_i32 = arith.constant 0 : i32
    %c0_i32_0 = arith.constant 0 : i32
    return %c0_i32, %arg0 : i32, i32
  }
  func.func @transform_2(%arg0: i32) -> (i32, i32) {
    %c0_i32 = arith.constant 0 : i32
    %c0_i32_0 = arith.constant 0 : i32
    %c0_i32_1 = arith.constant 0 : i32
    return %c0_i32, %c0_i32_0 : i32, i32
  }
  func.func @transform_3(%arg0: i32) -> (i32, i32) {
    %c0_i32 = arith.constant 0 : i32
    %c0_i32_0 = arith.constant 0 : i32
    %c0_i32_1 = arith.constant 0 : i32
    return %c0_i32, %c0_i32_0 : i32, i32
  }
  func.func @transform_4(%arg0: i32) -> (i32, i32) {
    %c0_i32 = arith.constant 0 : i32
    %c0_i32_0 = arith.constant 0 : i32
    %c0_i32_1 = arith.constant 0 : i32
    return %c0_i32, %c0_i32_0 : i32, i32
  }
  func.func @transform_5(%arg0: i32) -> (i32, i32) {
    %c0_i32 = arith.constant 0 : i32
    %c0_i32_0 = arith.constant 0 : i32
    %c0_i32_1 = arith.constant 0 : i32
    return %c0_i32, %c0_i32_0 : i32, i32
  }
  func.func @transform_6(%arg0: i32) -> (i32, i32) {
    %c0_i32 = arith.constant 0 : i32
    %c0_i32_0 = arith.constant 0 : i32
    %c0_i32_1 = arith.constant 0 : i32
    return %c0_i32, %c0_i32_0 : i32, i32
  }
  func.func @transform_7(%arg0: i32) -> (i32, i32) {
    %c0_i32 = arith.constant 0 : i32
    %c0_i32_0 = arith.constant 0 : i32
    %c0_i32_1 = arith.constant 0 : i32
    return %c0_i32, %c0_i32_0 : i32, i32
  }
  func.func @transform_8(%arg0: i32) -> (i32, i32) {
    %c0_i32 = arith.constant 0 : i32
    %c0_i32_0 = arith.constant 0 : i32
    return %c0_i32, %arg0 : i32, i32
  }
}

</mosaic_0001>

<bundles_post_ra>
// kernel: tpu_custom_call.1
= control target key start
LH: loop header
LB: loop body
LE: loop exit
PB: predicated region body
PF: predicated region fallthrough
CT: control target
= control target key end

     0   :  { %vm63_vm0 = vcmask 64512   ;;  %v737_v9 = vmov 0   ;;  %vm290_vm1 = vcmask 261120   ;;  %s921_s0 = inlined_call_operand.vmem [shape: f32[8,128], index: 0, kind: input, shape index: {}]   ;;  %s922_s1 = inlined_call_operand.vmem [shape: f32[32,128], index: 1, kind: input, shape index: {}]   ;;  %s923_s2 = inlined_call_operand.vmem [shape: f32[32,8], index: 2, kind: input, shape index: {}]   ;;  %s924_s3 = inlined_call_operand.vmem [shape: f32[32,8], index: 3, kind: input, shape index: {}]   ;;  %s925_s4 = inlined_call_operand.vmem [shape: f32[32,1], index: 4, kind: input, shape index: {}]   ;;  %s926_s5 = inlined_call_operand.vmem [shape: f32[32,1], index: 5, kind: input, shape index: {}]   ;;  %s927_s6 = inlined_call_operand.vmem [shape: f32[32,32], index: 6, kind: input, shape index: {}]   ;;  %s928_s7 = inlined_call_operand.vmem [shape: f32[32,32], index: 7, kind: input, shape index: {}]   ;;  %s929_s8 = inlined_call_operand.hbm [shape: f32[32,128], index: 8, kind: output, shape index: {}]  }
   0x1   :  { %v30_v0 = vld [vmem:[%s921_s0] sm:$0xff]  ;;  %v36_v2 = vld [vmem:[%s923_s2 + $0x8] sm:$0xff]  ;;  %v37_v5 = vld [vmem:[%s923_s2 + $0x10] sm:$0xff]  ;;  %687 = vset.pattern.permute.xlu0 %v737_v9  ;;  %688 = vset.pattern.permute.xlu1 %v737_v9 }
   0x2   :  { %v35_v1 = vld [vmem:[%s923_s2] sm:$0xff]  ;;  %607 = vmatprep.subr.mxu0 %v30_v0  ;;  %v804_v4 = vld [vmem:[%s922_s1 + $0x8] sm:$0xff]  ;;  %v814_v7 = vld [vmem:[%s922_s1 + $0x10] sm:$0xff]  ;;  %615 = vmatprep.subr.mxu1 %v30_v0 }
   0x3   :  { %609 = vmatprep.mubr.msk.f32.mxu0 %vm63_vm0, %v35_v1  ;;  %v799_v3 = vld [vmem:[%s922_s1] sm:$0xff]  ;;  %608 = vmatpush3.msra.mxu0 %v30_v0  ;;  %v819_v8 = vld [vmem:[%s922_s1 + $0x18] sm:$0xff]  ;;  %v41_v13 = vld [vmem:[%s925_s4 + $0x10] sm:$0xff] }
   0x4   :  { %v651_v6 = vpack.c.bf16 %v804_v4, %v799_v3  ;;  %610 = vmatmul.mubr.msk.f32.vlgmr.msra.gmra.mrb[0].mxu0 %vm63_vm0, %v36_v2  ;;  %v655_v10 = vpack.c.bf16 %v819_v8, %v814_v7  ;;  %v38_v11 = vld [vmem:[%s923_s2 + $0x18] sm:$0xff]  ;;  %v39_v12 = vld [vmem:[%s925_s4] sm:$0xff]  ;;  %55 = vperm.xlu1 %688, %v41_v13   ;;  %v40_v15 = vld [vmem:[%s925_s4 + $0x8] sm:$0xff] }
   0x5   :  { %612 = vmatprep.mubr.msk.f32.mxu0 %vm63_vm0, %v37_v5  ;;  %v286_v14 = vld [vmem:[%s927_s6] sm:$0xff]  ;;  %45 = vperm.xlu0 %687, %v39_v12   ;;  %v42_v16 = vld [vmem:[%s925_s4 + $0x18] sm:$0xff] }
   0x6   :  { %652 = vmatprep.subr.bf16.mxu0 %v651_v6 }
   0x7   :  { %654 = vmatpush3.bf16.msra.mxu0 %v651_v6 }
   0x8   :  { %656 = vmatprep.subr.bf16.mxu0 %v655_v10  ;;  %613 = vmatmul.mubr.msk.f32.gmra.mrb[2].mxu0 %vm63_vm0, %v38_v11 }
   0x9   :  { %13 = vsyncpa [#allocation3], 0  ;;  %631 = vmatprep.mubr.msk.f32.mxu0 %vm290_vm1, %v286_v14  ;;  %616 = vmatpush3.msra.mxu1 %v30_v0  ;;  %v287_v17 = vld [vmem:[%s927_s6 + $0x8] sm:$0xff]  ;;  %v288_v18 = vld [vmem:[%s927_s6 + $0x10] sm:$0xff] }
   0xa   :  { %50 = vperm.xlu0 %687, %v40_v15   ;;  %60 = vperm.xlu1 %688, %v42_v16   ;;  %v165_v19 = vld [vmem:[%s926_s5] sm:$0xff]  ;;  %v166_v20 = vld [vmem:[%s926_s5 + $0x8] sm:$0xff]  ;;  %v289_v21 = vld [vmem:[%s927_s6 + $0x18] sm:$0xff] }
   0xb   :  { %658 = vmatpush3.bf16.msra.mxu0 %v655_v10  ;;  %v167_v22 = vld [vmem:[%s926_s5 + $0x10] sm:$0xff]  ;;  %v168_v23 = vld [vmem:[%s926_s5 + $0x18] sm:$0xff]  ;;  %v161_v24 = vld [vmem:[%s924_s3] sm:$0xff] }
   0xc   :  { %617 = vmatprep.mubr.msk.f32.mxu1 %vm63_vm0, %v161_v24  ;;  %v162_v25 = vld [vmem:[%s924_s3 + $0x8] sm:$0xff]  ;;  %v163_v26 = vld [vmem:[%s924_s3 + $0x10] sm:$0xff]  ;;  %v164_v27 = vld [vmem:[%s924_s3 + $0x18] sm:$0xff] }
   0xd   :  { %618 = vmatmul.mubr.msk.f32.vlgmr.msra.gmra.mrb[0].mxu1 %vm63_vm0, %v162_v25  ;;  %v416_v28 = vld [vmem:[%s928_s7] sm:$0xff]  ;;  %v417_v63 = vld [vmem:[%s928_s7 + $0x8] sm:$0xff]  ;;  %v418_v0 = vld [vmem:[%s928_s7 + $0x10] sm:$0xff] }
   0xe   :  { %632 = vmatmul.mubr.msk.f32.vlgmr.msra.gmra.mrb[0].mxu0 %vm290_vm1, %v287_v17  ;;  %171 = vperm.xlu0 %687, %v165_v19   ;;  %v419_v1 = vld [vmem:[%s928_s7 + $0x18] sm:$0xff]  ;;  %s738_s7 = smov [#allocation2]  }
   0xf   :  { %634 = vmatprep.mubr.msk.f32.mxu0 %vm290_vm1, %v288_v18  ;;  %176 = vperm.xlu1 %688, %v166_v20   ;;  %s550_s9 = sshll.u32 %s738_s7, 4  ;;  %s551_s9 = int_to_ptr.vmem [resolvable:$true] %s550_s9 }
  0x10   :  { %620 = vmatprep.mubr.msk.f32.mxu1 %vm63_vm0, %v163_v26  ;;  %s713_s10 = scalar_lea.vmem %s551_s9, 512  ;;  %p718_p1 = scmp.lt.s32.totalorder %s551_s9, %s551_s9 }
  0x11   :  { %621 = vmatmul.mubr.msk.f32.gmra.mrb[2].mxu1 %vm63_vm0, %v164_v27  ;;  %p714_p0 = scmp.ne.s32.totalorder %s551_s9, %s713_s10  ;;  %p719_p2 = scmp.lt.s32.totalorder %s713_s10, %s713_s10 }
  0x12   :  { %635 = vmatmul.mubr.msk.f32.gmra.mrb[2].mxu0 %vm290_vm1, %v289_v21  ;;  %181 = vperm.xlu0 %687, %v167_v22  }
  0x13   :  { %186 = vperm.xlu1 %688, %v168_v23   ;;  %645 = vmatprep.mubr.msk.f32.mxu1 %vm290_vm1, %v416_v28  ;;  %p720_p3 = por %p719_p2, %p718_p1 }
  0x15   :  { %p721_p4 = pnand %p720_p3, %p714_p0 }
  0x83   :  { %v56_v30 = vpop.permute.xlu1 %55 }
  0x84   :  { %v46_v29 = vpop.permute.xlu0 %45 }
  0x89   :  { %v51_v31 = vpop.permute.xlu0 %50  ;;  %v61_v37 = vpop.permute.xlu1 %60 }
  0x8d   :  { %v172_v5 = vpop.permute.xlu0 %171 }
  0x8e   :  { %v177_v2 = vpop.permute.xlu1 %176 }
  0x91   :  { %v182_v14 = vpop.permute.xlu0 %181 }
  0x92   :  { %v187_v12 = vpop.permute.xlu1 %186 }
  0xe1   :  { %v633_v32 = vpop.f32.mrb[0].mxu0 }
  0xe2   :  { %v667_v33 = vadd.f32 %v633_v32, %v51_v31  ;;  %v369_v34 = vpop.f32.mrb[1].mxu0 }
  0xe3   :  { %v668_v35 = vadd.f32 %v369_v34, %v46_v29 }
  0xe4   :  { %v574_v36 = vmul.f32 -1.442695, %v667_v33 }
  0xe5   :  { %v573_v38 = vmul.f32 -1.442695, %v668_v35  ;;  %v636_v39 = vpop.f32.mrb[2].mxu0 }
  0xe6   :  { %689 = vpow2.f32 %v574_v36  ;;  %v669_v40 = vadd.f32 %v636_v39, %v61_v37  ;;  %v379_v41 = vpop.f32.mrb[3].mxu0 }
  0xe7   :  { %691 = vpow2.f32 %v573_v38  ;;  %v670_v42 = vadd.f32 %v379_v41, %v56_v30 }
  0xe8   :  { %v576_v43 = vmul.f32 -1.442695, %v669_v40 }
  0xe9   :  { %v575_v44 = vmul.f32 -1.442695, %v670_v42 }
  0xea   :  { %693 = vpow2.f32 %v576_v43 }
  0xeb   :  { %695 = vpow2.f32 %v575_v44 }
  0xf0   :  { %v690_v45 = vpop.eup %689 }
  0xf1   :  { %v692_v46 = vpop.eup %691  ;;  %v405_v47 = vadd.f32 1.0, %v690_v45 }
  0xf2   :  { %v404_v48 = vadd.f32 1.0, %v692_v46 }
  0xf3   :  { %697 = vrcp.f32 %v405_v47 }
  0xf4   :  { %v694_v49 = vpop.eup %693  ;;  %699 = vrcp.f32 %v404_v48 }
  0xf5   :  { %v696_v50 = vpop.eup %695  ;;  %v407_v51 = vadd.f32 1.0, %v694_v49 }
  0xf6   :  { %v406_v52 = vadd.f32 1.0, %v696_v50 }
  0xf7   :  { %701 = vrcp.f32 %v407_v51 }
  0xf8   :  { %703 = vrcp.f32 %v406_v52 }
  0xfd   :  { %v698_v53 = vpop.eup %697 }
  0xfe   :  { %v700_v54 = vpop.eup %699  ;;  %v421_v55 = vmul.f32 %v698_v53, %v804_v4  ;;  %v530_v20 = vsub.f32 1.0, %v698_v53 }
  0xff   :  { %v420_v56 = vmul.f32 %v700_v54, %v799_v3  ;;  %v529_v22 = vsub.f32 1.0, %v700_v54 }
 0x101   :  { %v702_v57 = vpop.eup %701  ;;  %v659_v58 = vpack.c.bf16 %v421_v55, %v420_v56 }
 0x102   :  { %v704_v59 = vpop.eup %703  ;;  %v423_v60 = vmul.f32 %v702_v57, %v819_v8  ;;  %v532_v28 = vsub.f32 1.0, %v702_v57 }
 0x103   :  { %660 = vmatprep.subr.bf16.mxu1 %v659_v58  ;;  %v422_v61 = vmul.f32 %v704_v59, %v814_v7  ;;  %v531_v30 = vsub.f32 1.0, %v704_v59 }
 0x104   :  { %662 = vmatpush3.bf16.msra.mxu1 %v659_v58 }
 0x105   :  { %v663_v62 = vpack.c.bf16 %v423_v60, %v422_v61 }
 0x107   :  { %664 = vmatprep.subr.bf16.mxu1 %v663_v62 }
 0x108   :  { %666 = vmatpush3.bf16.msra.mxu1 %v663_v62 }
 0x10b   :  { %646 = vmatmul.mubr.msk.f32.vlgmr.msra.gmra.mrb[0].mxu1 %vm290_vm1, %v417_v63 }
 0x10c   :  { %648 = vmatprep.mubr.msk.f32.mxu1 %vm290_vm1, %v418_v0 }
 0x10f   :  { %649 = vmatmul.mubr.msk.f32.gmra.mrb[2].mxu1 %vm290_vm1, %v419_v1 }
 0x1de   :  { %v647_v6 = vpop.f32.mrb[0].mxu1 }
 0x1df   :  { %v671_v9 = vadd.f32 %v647_v6, %v177_v2  ;;  %v502_v10 = vpop.f32.mrb[1].mxu1 }
 0x1e0   :  { %v672_v11 = vadd.f32 %v502_v10, %v172_v5 }
 0x1e1   :  { %705 = vtanh.f32 %v671_v9 }
 0x1e2   :  { %707 = vtanh.f32 %v672_v11  ;;  %v650_v13 = vpop.f32.mrb[2].mxu1 }
 0x1e3   :  { %v673_v15 = vadd.f32 %v650_v13, %v187_v12  ;;  %v512_v16 = vpop.f32.mrb[3].mxu1 }
 0x1e4   :  { %v674_v17 = vadd.f32 %v512_v16, %v182_v14 }
 0x1e5   :  { %709 = vtanh.f32 %v673_v15 }
 0x1e6   :  { %711 = vtanh.f32 %v674_v17 }
 0x1eb   :  { %v706_v18 = vpop.eup %705 }
 0x1ec   :  { %v708_v19 = vpop.eup %707  ;;  %v534_v21 = vsub.f32 %v706_v18, %v804_v4 }
 0x1ed   :  { %v533_v23 = vsub.f32 %v708_v19, %v799_v3 }
 0x1ee   :  { %v538_v24 = vmul.f32 %v534_v21, %v530_v20 }
 0x1ef   :  { %v710_v25 = vpop.eup %709  ;;  %v537_v26 = vmul.f32 %v533_v23, %v529_v22 }
 0x1f0   :  { %v712_v27 = vpop.eup %711  ;;  %542 = vst [vmem:[#allocation2 + $0x8] sm:$0xff] %v538_v24  ;;  %v536_v29 = vsub.f32 %v710_v25, %v819_v8 }
 0x1f1   :  { %541 = vst [vmem:[#allocation2] sm:$0xff] %v537_v26  ;;  %v535_v31 = vsub.f32 %v712_v27, %v814_v7 }
 0x1f2   :  { %v540_v32 = vmul.f32 %v536_v29, %v532_v28 }
 0x1f3   :  { %v539_v4 = vmul.f32 %v535_v31, %v531_v30 }
 0x1f4   :  { %544 = vst [vmem:[#allocation2 + $0x18] sm:$0xff] %v540_v32 }
 0x1f5   :  { %543 = vst [vmem:[#allocation2 + $0x10] sm:$0xff] %v539_v4 }
 0x1f6   :  { %724 = shalt.err (!%p721_p4)
}
 0x1f7   :  { %s725_s13 = scalar_lea.hbm %s929_s8, 512 }
 0x1f8   :  { %p726_p5 = scmp.ne.s32.totalorder %s929_s8, %s725_s13  ;;  %p729_p6 = scmp.lt.u32.totalorder %s725_s13, %s929_s8 }
 0x1fa   :  { %p731_p7 = pnand %p729_p6, %p726_p5 }
 0x1fc   :  { %734 = shalt.err (!%p731_p7)
}
 0x1fd   :  { %s739_s16 = smov 128   ;;  %s740_s17 = smov 8  }
 0x1fe   :  { %556 = dma.vmem_to_hbm [thread:$0]  %s551_s9, 512, %s929_s8, [#allocation3], %s739_s16, %s739_s16, %s740_s17  }
 0x1ff   :  { %735 = dma.done.wait [#allocation3], 512  }
 0x200   :  { %736 = vsyncadd [#allocation3], 4294966784 }
 0x201   :  { %560 = vsyncpa [#allocation3], 1 }

</bundles_post_ra>
